<compile_context>
chip_gen: v5e
topology: v5e:2x2
jax: 0.10.0
libtpu: 0.0.40
codegen_flags: <defaults>
</compile_context>

<pallas_src>
import jax
import jax.numpy as jnp
from jax.experimental import pallas as pl
from jax.experimental.pallas import tpu as pltpu


def _round_up(n: int, m: int) -> int:
    return ((n + m - 1) // m) * m


# ----------------------------------------------------------------------------- kernel
def _fused_mlp_kernel(x_ref, we_ref, be_ref, w1_ref, b1_ref, w2_ref, b2_ref, o_ref):
    wd = we_ref.dtype  # weight dtype (f32 or bf16); biases are always f32

    # shared encoder: Linear + ReLU   (accumulate in f32, elementwise in f32)
    h = jnp.dot(x_ref[...].astype(wd), we_ref[...],
                preferred_element_type=jnp.float32) + be_ref[...]
    h = jnp.maximum(h, 0.0)

    # fused [network | prior] hidden layer: one matmul + one ReLU
    z = jnp.dot(h.astype(wd), w1_ref[...],
                preferred_element_type=jnp.float32) + b1_ref[...]
    z = jnp.maximum(z, 0.0)

    # fused output layer: prior_scale is pre-folded into the prior half of w2/b2, so this
    # single matmul IS  network(x) + prior_scale * prior_network(x).
    o_ref[...] = (jnp.dot(z.astype(wd), w2_ref[...],
                          preferred_element_type=jnp.float32) + b2_ref[...]).astype(o_ref.dtype)


# ---------------------------------------------------------------- weight fusion helpers
def prepare_prior_templates(params, prior_scale, lane: int = 128):
    """One-time cache of the FROZEN prior halves: pre-scaled by prior_scale and placed
    into zero-padded, lane-dense templates. Re-run only if the prior changes (it never
    does — it is frozen), not every training step."""
    pw1, pb1, pw2, pb2 = params["pw1"], params["pb1"], params["pw2"], params["pb2"]
    hid = pw1.shape[0]
    out_dim = pw2.shape[1]
    hid_p = _round_up(hid, lane)
    h2_p = _round_up(2 * hid, lane)
    out_p = _round_up(out_dim, lane)
    s = jnp.float32(prior_scale)

    w1_t = jnp.zeros((hid_p, h2_p), jnp.float32).at[:hid, hid:2 * hid].set(pw1)
    b1_t = jnp.zeros((1, h2_p), jnp.float32).at[:, hid:2 * hid].set(pb1)
    w2_t = jnp.zeros((h2_p, out_p), jnp.float32).at[hid:2 * hid, :out_dim].set(s * pw2)
    b2_t = jnp.zeros((1, out_p), jnp.float32).at[:, :out_dim].set(s * pb2)

    return {"w1": w1_t, "b1": b1_t, "w2": w2_t, "b2": b2_t,
            "hid": hid, "hid_p": hid_p, "h2_p": h2_p, "out_p": out_p, "out_dim": out_dim}


def fuse_trainable(templates, params, weight_dtype=jnp.bfloat16):
    """Per-step (cheap) fusion: write the TRAINABLE halves into copies of the cached
    prior templates.  No concat, no re-scaling of the frozen prior.  Weights are cast
    to `weight_dtype` (bf16 halves VMEM and doubles MXU rate on v6e/v7x); biases stay
    f32 so all VPU work is f32 (v5e-friendly)."""
    t = templates
    in_dim = params["we"].shape[0]
    hid_p, out_dim = t["hid_p"], t["out_dim"]

    def pad2(a, rows, cols):
        return jnp.pad(a, ((0, rows - a.shape[0]), (0, cols - a.shape[1])))

    we = pad2(params["we"], in_dim, hid_p)
    be = pad2(params["be"], 1, hid_p)
    w1 = jax.lax.dynamic_update_slice(t["w1"], params["w1"], (0, 0))
    b1 = jax.lax.dynamic_update_slice(t["b1"], params["b1"], (0, 0))
    w2 = jax.lax.dynamic_update_slice(t["w2"], params["w2"], (0, 0))
    b2 = t["b2"].at[:, :out_dim].add(params["b2"])

    return {
        "we": we.astype(weight_dtype), "be": be,
        "w1": w1.astype(weight_dtype), "b1": b1,
        "w2": w2.astype(weight_dtype), "b2": b2,
    }


# ---------------------------------------------------------------------------- wrapper
def network_with_prior_forward(x, fused, *, out_dim, block_b: int = 256):
    """x: [B, IN] float32.  fused: output of fuse_trainable."""
    B, in_dim = x.shape
    hid_p = fused["we"].shape[1]
    h2_p = fused["w1"].shape[1]
    out_p = fused["w2"].shape[1]

    # Batch tile: fill the 256-row MXU of v6e/v7x when B is large, but keep the batch
    # grid >= 2 steps so v7x's two TCs both get work and x/out tiles double-buffer.
    tb = min(block_b, max(8, _round_up(pl.cdiv(B, 2), 8)))
    grid = (pl.cdiv(B, tb),)  # no wrapper pad: partial last block's output store is masked

    weights = (fused["we"], fused["be"], fused["w1"], fused["b1"], fused["w2"], fused["b2"])

    def resident(arr):
        # Full-array block, constant index_map, SINGLE-buffered: DMA'd once, then stays
        # resident in VMEM across all grid steps (default Buffered(2) would double the
        # weight footprint for nothing).
        zeros = (0,) * arr.ndim
        return pl.BlockSpec(arr.shape, lambda i, _z=zeros: _z,
                            pipeline_mode=pl.Buffered(1))

    # Explicit VMEM budget: resident weights (x1 buffer) + double-buffered x/out tiles
    # + f32 intermediates h/z + bf16 operand casts, x2 safety + 8 MiB headroom, clamped
    # to 64 MiB (valid on v7x per-TC VMEM; also lifts v5e's 16 MiB scoped default).
    wbytes = sum(int(a.size) * a.dtype.itemsize for a in weights)
    iobytes = 2 * tb * in_dim * 4 + 2 * tb * out_p * 4
    interbytes = tb * (hid_p + h2_p) * 4 + tb * (in_dim + hid_p + h2_p) * 2
    vmem_limit = int(min(max(2 * (wbytes + iobytes + interbytes) + (8 << 20), 16 << 20),
                         64 << 20))

    cost = pl.CostEstimate(
        flops=2 * B * (in_dim * hid_p + hid_p * h2_p + h2_p * out_p),
        transcendentals=0,
        bytes_accessed=int(x.size) * x.dtype.itemsize + wbytes + B * out_p * 4,
    )

    out = pl.pallas_call(
        _fused_mlp_kernel,
        out_shape=jax.ShapeDtypeStruct((B, out_p), jnp.float32),
        grid=grid,
        in_specs=[pl.BlockSpec((tb, in_dim), lambda i: (i, 0))]   # activations: batch-tiled
                 + [resident(a) for a in weights],
        out_specs=pl.BlockSpec((tb, out_p), lambda i: (i, 0)),
        compiler_params=pltpu.CompilerParams(
            dimension_semantics=("parallel",),
            vmem_limit_bytes=vmem_limit,
        ),
        cost_estimate=cost,
    )(x, *weights)

    return out[:, :out_dim]


# ------------------------------------------------------------------------- test plumbing
def init_params(key, in_dim, hid_dim, out_dim):
    ks = jax.random.split(key, 10)

    def lin(kw, d_in, d_out):
        scale = 1.0 / jnp.sqrt(jnp.float32(d_in))
        return jax.random.uniform(kw, (d_in, d_out), jnp.float32, -scale, scale)

    return {
        # shared encoder (trainable)
        "we": lin(ks[0], in_dim, hid_dim),
        "be": jax.random.uniform(ks[1], (1, hid_dim), jnp.float32, -0.05, 0.05),
        # trainable network
        "w1": lin(ks[2], hid_dim, hid_dim),
        "b1": jax.random.uniform(ks[3], (1, hid_dim), jnp.float32, -0.05, 0.05),
        "w2": lin(ks[4], hid_dim, out_dim),
        "b2": jax.random.uniform(ks[5], (1, out_dim), jnp.float32, -0.05, 0.05),
        # prior network (frozen)
        "pw1": lin(ks[6], hid_dim, hid_dim),
        "pb1": jax.random.uniform(ks[7], (1, hid_dim), jnp.float32, -0.05, 0.05),
        "pw2": lin(ks[8], hid_dim, out_dim),
        "pb2": jax.random.uniform(ks[9], (1, out_dim), jnp.float32, -0.05, 0.05),
    }


def reference_forward(x, p, prior_scale):
    h = jnp.maximum(x @ p["we"] + p["be"], 0.0)
    n = jnp.maximum(h @ p["w1"] + p["b1"], 0.0) @ p["w2"] + p["b2"]
    pr = jnp.maximum(h @ p["pw1"] + p["pb1"], 0.0) @ p["pw2"] + p["pb2"]
    return n + prior_scale * pr


if __name__ == "__main__":
    B, IN, HID, OUT = 256, 16, 32, 8
    PRIOR_SCALE = 3.0

    key = jax.random.PRNGKey(0)
    kx, kp = jax.random.split(key)
    x = jax.random.normal(kx, (B, IN), jnp.float32)
    params = init_params(kp, IN, HID, OUT)
    ref = reference_forward(x, params, PRIOR_SCALE)

    # Frozen prior halves cached once (pre-scaled, pre-padded).
    templates = prepare_prior_templates(params, PRIOR_SCALE)

    # --- f32 weight path: exact check against the f32 reference ---
    fused_f32 = fuse_trainable(templates, params, weight_dtype=jnp.float32)
    out_f32 = jax.block_until_ready(network_with_prior_forward(x, fused_f32, out_dim=OUT))
    assert out_f32.shape == (B, OUT)
    assert jnp.allclose(out_f32, ref, atol=1e-3, rtol=1e-3), \
        float(jnp.max(jnp.abs(out_f32 - ref)))

    # --- bf16 weight path (perf config for v6e/v7x): loose tolerance ---
    fused_bf16 = fuse_trainable(templates, params, weight_dtype=jnp.bfloat16)
    out_bf16 = jax.block_until_ready(network_with_prior_forward(x, fused_bf16, out_dim=OUT))
    assert jnp.allclose(out_bf16, ref, atol=1e-1, rtol=5e-2), \
        float(jnp.max(jnp.abs(out_bf16 - ref)))

    # --- ragged batch: exercises pl.cdiv grid + masked partial-block store (no jnp.pad) ---
    Br = 200
    out_ragged = jax.block_until_ready(
        network_with_prior_forward(x[:Br], fused_f32, out_dim=OUT))
    assert out_ragged.shape == (Br, OUT)
    assert jnp.allclose(out_ragged, ref[:Br], atol=1e-3, rtol=1e-3), \
        float(jnp.max(jnp.abs(out_ragged - ref[:Br])))

    print("KERNEL_OK")
</pallas_src>

<mosaic_0001>
module attributes {stable_mosaic.version = 11 : i64} {
  func.func @_fused_mlp_kernel(%arg0: i32, %arg1: memref<128x16xf32, #tpu.memory_space<vmem>>, %arg2: memref<16x128xf32, #tpu.memory_space<vmem>>, %arg3: memref<1x128xf32, #tpu.memory_space<vmem>>, %arg4: memref<128x128xf32, #tpu.memory_space<vmem>>, %arg5: memref<1x128xf32, #tpu.memory_space<vmem>>, %arg6: memref<128x128xf32, #tpu.memory_space<vmem>>, %arg7: memref<1x128xf32, #tpu.memory_space<vmem>>, %arg8: memref<128x128xf32, #tpu.memory_space<vmem>>) attributes {dimension_semantics = [#tpu.dimension_semantics<parallel>], iteration_bounds = array<i64: 2>, scalar_prefetch = 0 : i64, scratch_operands = 0 : i64, tpu.core_type = #tpu.core_type<tc>, window_params = [{transform_indices = @transform_0, window_bounds = array<i64: 128, 16>}, {pipeline_mode = #tpu.pipeline_mode<synchronous>, transform_indices = @transform_1, window_bounds = array<i64: 16, 128>}, {pipeline_mode = #tpu.pipeline_mode<synchronous>, transform_indices = @transform_2, window_bounds = array<i64: 1, 128>}, {pipeline_mode = #tpu.pipeline_mode<synchronous>, transform_indices = @transform_3, window_bounds = array<i64: 128, 128>}, {pipeline_mode = #tpu.pipeline_mode<synchronous>, transform_indices = @transform_4, window_bounds = array<i64: 1, 128>}, {pipeline_mode = #tpu.pipeline_mode<synchronous>, transform_indices = @transform_5, window_bounds = array<i64: 128, 128>}, {pipeline_mode = #tpu.pipeline_mode<synchronous>, transform_indices = @transform_6, window_bounds = array<i64: 1, 128>}, {transform_indices = @transform_7, window_bounds = array<i64: 128, 128>}]} {
    %c0 = arith.constant 0 : index
    %c0_0 = arith.constant 0 : index
    %0 = vector.load %arg1[%c0, %c0_0] : memref<128x16xf32, #tpu.memory_space<vmem>>, vector<128x16xf32>
    %c0_1 = arith.constant 0 : index
    %c0_2 = arith.constant 0 : index
    %1 = vector.load %arg2[%c0_1, %c0_2] : memref<16x128xf32, #tpu.memory_space<vmem>>, vector<16x128xf32>
    %cst = arith.constant dense<0.000000e+00> : vector<128x128xf32>
    %2 = tpu.matmul %0, %1, %cst {dimension_numbers = #tpu.dot_dimension_numbers<[1], [0], [0], [1], [0, 0, 1, 1], [], []>} : vector<128x16xf32>, vector<16x128xf32>, vector<128x128xf32> -> vector<128x128xf32>
    %c0_3 = arith.constant 0 : index
    %c0_4 = arith.constant 0 : index
    %3 = vector.load %arg3[%c0_3, %c0_4] : memref<1x128xf32, #tpu.memory_space<vmem>>, vector<1x128xf32>
    %4 = vector.broadcast %3 : vector<1x128xf32> to vector<128x128xf32>
    %5 = arith.addf %2, %4 : vector<128x128xf32>
    %cst_5 = arith.constant 0.000000e+00 : f32
    %6 = vector.broadcast %cst_5 : f32 to vector<128x128xf32>
    %7 = arith.maximumf %5, %6 : vector<128x128xf32>
    %c0_6 = arith.constant 0 : index
    %c0_7 = arith.constant 0 : index
    %8 = vector.load %arg4[%c0_6, %c0_7] : memref<128x128xf32, #tpu.memory_space<vmem>>, vector<128x128xf32>
    %cst_8 = arith.constant dense<0.000000e+00> : vector<128x128xf32>
    %9 = tpu.matmul %7, %8, %cst_8 {dimension_numbers = #tpu.dot_dimension_numbers<[1], [0], [0], [1], [0, 0, 1, 1], [], []>} : vector<128x128xf32>, vector<128x128xf32>, vector<128x128xf32> -> vector<128x128xf32>
    %c0_9 = arith.constant 0 : index
    %c0_10 = arith.constant 0 : index
    %10 = vector.load %arg5[%c0_9, %c0_10] : memref<1x128xf32, #tpu.memory_space<vmem>>, vector<1x128xf32>
    %11 = vector.broadcast %10 : vector<1x128xf32> to vector<128x128xf32>
    %12 = arith.addf %9, %11 : vector<128x128xf32>
    %cst_11 = arith.constant 0.000000e+00 : f32
    %13 = vector.broadcast %cst_11 : f32 to vector<128x128xf32>
    %14 = arith.maximumf %12, %13 : vector<128x128xf32>
    %c0_12 = arith.constant 0 : index
    %c0_13 = arith.constant 0 : index
    %15 = vector.load %arg6[%c0_12, %c0_13] : memref<128x128xf32, #tpu.memory_space<vmem>>, vector<128x128xf32>
    %cst_14 = arith.constant dense<0.000000e+00> : vector<128x128xf32>
    %16 = tpu.matmul %14, %15, %cst_14 {dimension_numbers = #tpu.dot_dimension_numbers<[1], [0], [0], [1], [0, 0, 1, 1], [], []>} : vector<128x128xf32>, vector<128x128xf32>, vector<128x128xf32> -> vector<128x128xf32>
    %c0_15 = arith.constant 0 : index
    %c0_16 = arith.constant 0 : index
    %17 = vector.load %arg7[%c0_15, %c0_16] : memref<1x128xf32, #tpu.memory_space<vmem>>, vector<1x128xf32>
    %18 = vector.broadcast %17 : vector<1x128xf32> to vector<128x128xf32>
    %19 = arith.addf %16, %18 : vector<128x128xf32>
    %c0_17 = arith.constant 0 : index
    %c0_18 = arith.constant 0 : index
    %20 = vector.load %arg8[%c0_17, %c0_18] : memref<128x128xf32, #tpu.memory_space<vmem>>, vector<128x128xf32>
    tpu.vector_store %arg8[%c0_17, %c0_18], %19 {strides = array<i32>} : memref<128x128xf32, #tpu.memory_space<vmem>>, vector<128x128xf32>,
    return
  }
  func.func @transform_0(%arg0: i32) -> (i32, i32) {
    %c0_i32 = arith.constant 0 : i32
    %c0_i32_0 = arith.constant 0 : i32
    return %arg0, %c0_i32 : i32, i32
  }
  func.func @transform_1(%arg0: i32) -> (i32, i32) {
    %c0_i32 = arith.constant 0 : i32
    %c0_i32_0 = arith.constant 0 : i32
    %c0_i32_1 = arith.constant 0 : i32
    return %c0_i32, %c0_i32_0 : i32, i32
  }
  func.func @transform_2(%arg0: i32) -> (i32, i32) {
    %c0_i32 = arith.constant 0 : i32
    %c0_i32_0 = arith.constant 0 : i32
    %c0_i32_1 = arith.constant 0 : i32
    return %c0_i32, %c0_i32_0 : i32, i32
  }
  func.func @transform_3(%arg0: i32) -> (i32, i32) {
    %c0_i32 = arith.constant 0 : i32
    %c0_i32_0 = arith.constant 0 : i32
    %c0_i32_1 = arith.constant 0 : i32
    return %c0_i32, %c0_i32_0 : i32, i32
  }
  func.func @transform_4(%arg0: i32) -> (i32, i32) {
    %c0_i32 = arith.constant 0 : i32
    %c0_i32_0 = arith.constant 0 : i32
    %c0_i32_1 = arith.constant 0 : i32
    return %c0_i32, %c0_i32_0 : i32, i32
  }
  func.func @transform_5(%arg0: i32) -> (i32, i32) {
    %c0_i32 = arith.constant 0 : i32
    %c0_i32_0 = arith.constant 0 : i32
    %c0_i32_1 = arith.constant 0 : i32
    return %c0_i32, %c0_i32_0 : i32, i32
  }
  func.func @transform_6(%arg0: i32) -> (i32, i32) {
    %c0_i32 = arith.constant 0 : i32
    %c0_i32_0 = arith.constant 0 : i32
    %c0_i32_1 = arith.constant 0 : i32
    return %c0_i32, %c0_i32_0 : i32, i32
  }
  func.func @transform_7(%arg0: i32) -> (i32, i32) {
    %c0_i32 = arith.constant 0 : i32
    %c0_i32_0 = arith.constant 0 : i32
    return %arg0, %c0_i32 : i32, i32
  }
}

</mosaic_0001>

<bundles_post_ra>
// kernel: tpu_custom_call.1
= control target key start
LH: loop header
LB: loop body
LE: loop exit
PB: predicated region body
PF: predicated region fallthrough
CT: control target
= control target key end

     0   :  { %12 = vsyncpa [#allocation3], 0  ;;  %s1193_s0 = inlined_call_operand.vmem [shape: f32[256,16], index: 0, kind: input, shape index: {}]   ;;  %s1194_s1 = inlined_call_operand.vmem [shape: f32[16,128], index: 1, kind: input, shape index: {}]   ;;  %s1195_s2 = inlined_call_operand.vmem [shape: f32[1,128], index: 2, kind: input, shape index: {}]   ;;  %s1196_s3 = inlined_call_operand.vmem [shape: f32[128,128], index: 3, kind: input, shape index: {}]   ;;  %s1197_s4 = inlined_call_operand.vmem [shape: f32[1,128], index: 4, kind: input, shape index: {}]   ;;  %s1198_s5 = inlined_call_operand.vmem [shape: f32[128,128], index: 5, kind: input, shape index: {}]   ;;  %s1199_s6 = inlined_call_operand.vmem [shape: f32[1,128], index: 6, kind: input, shape index: {}]   ;;  %s1200_s7 = inlined_call_operand.hbm [shape: f32[256,128], index: 7, kind: output, shape index: {}]  }
   0x1   :  { %14 = vsyncpa [#allocation3 + $0x1], 0  ;;  %s923_s24 = smov 0   ;;  %s925_s25 = smov 0  }
   0x2   :  { %s927_s26 = smov 0   ;;  %s929_s27 = smov 0  }
   0x3 LB: > { %s944_s28 = sadd.s32 4294967295, %s879_s27   ;;  %s712_s29 = sadd.s32 4294967294, %s879_s27   ;;  %s879_s27 = sphi %s929_s27, %s1206_s27   ;;  %s875_s26 = sphi %s927_s26, %s1205_s26   ;;  %s871_s25 = sphi %s925_s25, %s1204_s25   ;;  %s867_s24 = sphi %s923_s24, %s1203_s24  }
   0x4   : > { %s948_s30 = sadd.s32 1, %s879_s27   ;;  %s179_s8 = sadd.s32 1, %s875_s26 }
   0x5   : > { %s176_s9 = ssub.s32 %s879_s27, %s948_s30  ;;  %p189_p0 = scmp.ne.s32.totalorder %s875_s26, %s871_s25 }
   0x6   : > { %p177_p1 = scmp.eq.s32.totalorder %s176_s9, 0  ;;  %p190_p2 = scmp.eq.s32.totalorder %s944_s28, 1 }
   0x7   : > { %p195_p3 = scmp.ne.s32.totalorder %s871_s25, %s867_s24  ;;  %p196_p4 = scmp.eq.s32.totalorder %s712_s29, 1 }
   0x8   : > { %s959_s10 = scalar_select %p177_p1, %s875_s26, %s179_s8  }
   0x9   : > { %p961_p5 = por %p190_p2, %p189_p0  ;;  %p965_p6 = por %p196_p4, %p195_p3 }
   0xa   : > { %p715_p7 = scmp.ge.s32.totalorder %s879_s27, 1  ;;  %p241_p8 = scmp.lt.s32.totalorder %s879_s27, 3 }
   0xc   : > { %p242_p9 = pnand %p715_p7, %p241_p8 }
   0xd   : > { %s717_s17 = sshll.u32 (!%p242_p9), %s944_s28, 4  ;;  %s270_s22 = sand.u32 (!%p242_p9), 1, %s871_s25  }
   0xe   : > { %245 = sbr.rel (%p242_p9) target bundleno = 547 (0x223), region = 48  ;;  %p274_p10 = scmp.lt.s32.totalorder (!%p242_p9), %s717_s17, 31 }
   0xf   : > { %s716_s23 = sshll.u32 (!%p242_p9), %s270_s22, 7  ;;  %s740_s13 = sshll.u32 (!%p242_p9), %s944_s28, 7 }
  0x10   : > { %s1141_s9 = scalar_lea.vmem (!%p242_p9), [#allocation2], %s716_s23  ;;  %s837_s29 = scalar_lea.hbm (!%p242_p9), %s1200_s7, 256 }
  0x11   : > { %s647_s16 = sshll.u32 (!%p242_p9), %s1141_s9, 4  ;;  %s648_s16 = int_to_ptr.vmem [resolvable:$true] %s647_s16 }
  0x13   : > { %v297_v0 = vld [vmem:[%s1194_s1 + $0x8] sm:$0xff]  ;;  %v296_v1 = vld [vmem:[%s1194_s1] sm:$0xff]  ;;  %s1208_s17 = smov (!%p274_p10, %s717_s17), 31  ;;  %vm302_vm0 = vcmask 130048   ;;  %v447_v11 = vld [vmem:[%s1196_s3 + $0x78] sm:$0xff] }
  0x14   : > { %365 = vmatpush.msra.mxu0 %v297_v0  ;;  %s718_s18 = sshll.u32 %s1208_s17, 3  ;;  %v446_v12 = vld [vmem:[%s1196_s3 + $0x70] sm:$0xff]  ;;  %452 = vmatpush.msra.mxu1 %v447_v11  ;;  %v445_v13 = vld [vmem:[%s1196_s3 + $0x68] sm:$0xff]  ;;  %v444_v15 = vld [vmem:[%s1196_s3 + $0x60] sm:$0xff] }
  0x15   : > { %s981_s21 = scalar_lea.vmem %s1193_s0, %s718_s18  ;;  %741 = vmatpush.msra.mxu3 %v447_v11  ;;  %v443_v16 = vld [vmem:[%s1196_s3 + $0x58] sm:$0xff]  ;;  %v442_v17 = vld [vmem:[%s1196_s3 + $0x50] sm:$0xff]  ;;  %v441_v18 = vld [vmem:[%s1196_s3 + $0x48] sm:$0xff]  ;;  %s635_s18 = scalar_lea.sflag [#allocation3], %s270_s22 }
  0x16   : > { %366 = vmatpush.msra.mxu0 %v296_v1  ;;  %v280_v2 = vld [vmem:[%s981_s21] sm:$0xff]  ;;  %v281_v3 = vld [vmem:[%s981_s21 + $0x8] sm:$0xff]  ;;  %v282_v4 = vld [vmem:[%s981_s21 + $0x10] sm:$0xff]  ;;  %453 = vmatpush.msra.mxu1 %v446_v12 }
  0x17   : > { %719 = vmatmul.msk.f32.vlgmr.msra.gmra.mxu0 %vm302_vm0, %v280_v2  ;;  %v283_v5 = vld [vmem:[%s981_s21 + $0x18] sm:$0xff]  ;;  %v284_v6 = vld [vmem:[%s981_s21 + $0x20] sm:$0xff]  ;;  %v285_v7 = vld [vmem:[%s981_s21 + $0x28] sm:$0xff]  ;;  %742 = vmatpush.msra.mxu3 %v446_v12 }
  0x18   : > { %v286_v8 = vld [vmem:[%s981_s21 + $0x30] sm:$0xff]  ;;  %v287_v9 = vld [vmem:[%s981_s21 + $0x38] sm:$0xff]  ;;  %v288_v10 = vld [vmem:[%s981_s21 + $0x40] sm:$0xff]  ;;  %454 = vmatpush.msra.mxu1 %v445_v13 }
  0x19   : > { %v289_v14 = vld [vmem:[%s981_s21 + $0x48] sm:$0xff]  ;;  %743 = vmatpush.msra.mxu3 %v445_v13  ;;  %v290_v19 = vld [vmem:[%s981_s21 + $0x50] sm:$0xff]  ;;  %v440_v20 = vld [vmem:[%s1196_s3 + $0x40] sm:$0xff] }
  0x1a   : > { %455 = vmatpush.msra.mxu1 %v444_v15  ;;  %v439_v21 = vld [vmem:[%s1196_s3 + $0x38] sm:$0xff]  ;;  %v438_v22 = vld [vmem:[%s1196_s3 + $0x30] sm:$0xff]  ;;  %v437_v23 = vld [vmem:[%s1196_s3 + $0x28] sm:$0xff] }
  0x1b   : > { %744 = vmatpush.msra.mxu3 %v444_v15  ;;  %v291_v24 = vld [vmem:[%s981_s21 + $0x58] sm:$0xff]  ;;  %v436_v25 = vld [vmem:[%s1196_s3 + $0x20] sm:$0xff]  ;;  %v434_v27 = vld [vmem:[%s1196_s3 + $0x10] sm:$0xff] }
  0x1c   : > { %456 = vmatpush.msra.mxu1 %v443_v16  ;;  %v435_v26 = vld [vmem:[%s1196_s3 + $0x18] sm:$0xff]  ;;  %v292_v28 = vld [vmem:[%s981_s21 + $0x60] sm:$0xff]  ;;  %v433_v29 = vld [vmem:[%s1196_s3 + $0x8] sm:$0xff] }
  0x1d   : > { %745 = vmatpush.msra.mxu3 %v443_v16  ;;  %v432_v30 = vld [vmem:[%s1196_s3] sm:$0xff]  ;;  %v293_v31 = vld [vmem:[%s981_s21 + $0x68] sm:$0xff]  ;;  %v294_v32 = vld [vmem:[%s981_s21 + $0x70] sm:$0xff] }
  0x1e   : > { %457 = vmatpush.msra.mxu1 %v442_v17  ;;  %v295_v33 = vld [vmem:[%s981_s21 + $0x78] sm:$0xff]  ;;  %v1066_v34 = vld [vmem:[%s1195_s2] ss:$0 sm:$0xff]  ;;  %v547_v1 = vld [vmem:[%s1198_s5 + $0x70] sm:$0xff]  ;;  %s646_s21 = scalar_lea.hbm %s1200_s7, %s740_s13 }
  0x1f   : > { %720 = vmatmul.msk.f32.gmra.mxu0 %vm302_vm0, %v281_v3  ;;  %746 = vmatpush.msra.mxu3 %v442_v17  ;;  %v548_v62 = vld [vmem:[%s1198_s5 + $0x78] sm:$0xff]  ;;  %v546_v3 = vld [vmem:[%s1198_s5 + $0x68] sm:$0xff]  ;;  %v541_v11 = vld [vmem:[%s1198_s5 + $0x40] sm:$0xff]  ;;  %s649_s17 = sshll.u32 %s646_s21, 4  ;;  %s650_s17 = int_to_ptr.hbm [resolvable:$true] %s649_s17 }
  0x20   : > { %458 = vmatpush.msra.mxu1 %v441_v18  ;;  %553 = vmatpush.msra.mxu2 %v548_v62  ;;  %v540_v12 = vld [vmem:[%s1198_s5 + $0x38] sm:$0xff]  ;;  %v539_v15 = vld [vmem:[%s1198_s5 + $0x30] sm:$0xff]  ;;  %v538_v17 = vld [vmem:[%s1198_s5 + $0x28] sm:$0xff]  ;;  %s831_s19 = sshra.s32 %s650_s17, 4  ;;  %s832_s19 = int_to_ptr.hbm [resolvable:$true] %s831_s19 }
  0x21   : > { %747 = vmatpush.msra.mxu3 %v441_v18  ;;  %v537_v18 = vld [vmem:[%s1198_s5 + $0x20] sm:$0xff]  ;;  %s833_s28 = scalar_lea.hbm %s832_s19, 128  ;;  %p838_p0 = scmp.lt.s32.totalorder %s832_s19, %s1200_s7 }
  0x22   : > { %459 = vmatpush.msra.mxu1 %v440_v20  ;;  %554 = vmatpush.msra.mxu2 %v547_v1  ;;  %p834_p11 = scmp.ne.s32.totalorder %s832_s19, %s833_s28  ;;  %p839_p1 = scmp.lt.s32.totalorder %s837_s29, %s833_s28 }
  0x23   : > { %748 = vmatpush.msra.mxu3 %v440_v20 }
  0x24   : > { %460 = vmatpush.msra.mxu1 %v439_v21  ;;  %555 = vmatpush.msra.mxu2 %v546_v3  ;;  %p835_p12 = pnand %p834_p11, %p961_p5  ;;  %p840_p2 = por %p839_p1, %p838_p0 }
  0x25   : > { %749 = vmatpush.msra.mxu3 %v439_v21 }
  0x26   : > { %461 = vmatpush.msra.mxu1 %v438_v22  ;;  %p836_p13 = pneg %p835_p12 }
  0x27   : > { %721 = vmatmul.msk.f32.gmra.mxu0 %vm302_vm0, %v282_v4  ;;  %750 = vmatpush.msra.mxu3 %v438_v22  ;;  %v545_v4 = vld [vmem:[%s1198_s5 + $0x60] sm:$0xff]  ;;  %v535_v22 = vld [vmem:[%s1198_s5 + $0x10] sm:$0xff] }
  0x28   : > { %462 = vmatpush.msra.mxu1 %v437_v23  ;;  %556 = vmatpush.msra.mxu2 %v545_v4  ;;  %p841_p3 = pnand %p840_p2, %p836_p13 }
  0x29   : > { %751 = vmatpush.msra.mxu3 %v437_v23 }
  0x2a   : > { %463 = vmatpush.msra.mxu1 %v436_v25 }
  0x2b   : > { %752 = vmatpush.msra.mxu3 %v436_v25  ;;  %v533_v25 = vld [vmem:[%s1198_s5] sm:$0xff] }
  0x2c   : > { %464 = vmatpush.msra.mxu1 %v435_v26 }
  0x2d   : > { %753 = vmatpush.msra.mxu3 %v435_v26 }
  0x2e   : > { %465 = vmatpush.msra.mxu1 %v434_v27 }
  0x2f   : > { %722 = vmatmul.msk.f32.gmra.mxu0 %vm302_vm0, %v283_v5  ;;  %754 = vmatpush.msra.mxu3 %v434_v27  ;;  %v544_v5 = vld [vmem:[%s1198_s5 + $0x58] sm:$0xff] }
  0x30   : > { %466 = vmatpush.msra.mxu1 %v433_v29  ;;  %557 = vmatpush.msra.mxu2 %v544_v5 }
  0x31   : > { %755 = vmatpush.msra.mxu3 %v433_v29 }
  0x32   : > { %467 = vmatpush.msra.mxu1 %v432_v30 }
  0x33   : > { %756 = vmatpush.msra.mxu3 %v432_v30 }
  0x35   : > { %757 = vmatpush.msrb.mxu3 %v548_v62 }
  0x37   : > { %723 = vmatmul.msk.f32.gmra.mxu0 %vm302_vm0, %v284_v6  ;;  %758 = vmatpush.msrb.mxu3 %v547_v1 }
  0x39   : > { %759 = vmatpush.msrb.mxu3 %v546_v3 }
  0x3b   : > { %760 = vmatpush.msrb.mxu3 %v545_v4 }
  0x3d   : > { %761 = vmatpush.msrb.mxu3 %v544_v5 }
  0x3f   : > { %724 = vmatmul.msk.f32.gmra.mxu0 %vm302_vm0, %v285_v7 }
  0x47   : > { %725 = vmatmul.msk.f32.gmra.mxu0 %vm302_vm0, %v286_v8  ;;  %v543_v8 = vld [vmem:[%s1198_s5 + $0x50] sm:$0xff] }
  0x48   : > { %558 = vmatpush.msra.mxu2 %v543_v8  ;;  %762 = vmatpush.msrb.mxu3 %v543_v8 }
  0x4f   : > { %726 = vmatmul.msk.f32.gmra.mxu0 %vm302_vm0, %v287_v9 }
  0x57   : > { %727 = vmatmul.msk.f32.gmra.mxu0 %vm302_vm0, %v288_v10  ;;  %v542_v10 = vld [vmem:[%s1198_s5 + $0x48] sm:$0xff] }
  0x58   : > { %559 = vmatpush.msra.mxu2 %v542_v10  ;;  %763 = vmatpush.msrb.mxu3 %v542_v10 }
  0x5a   : > { %560 = vmatpush.msra.mxu2 %v541_v11  ;;  %764 = vmatpush.msrb.mxu3 %v541_v11 }
  0x5c   : > { %561 = vmatpush.msra.mxu2 %v540_v12  ;;  %765 = vmatpush.msrb.mxu3 %v540_v12 }
  0x5e   : > { %562 = vmatpush.msra.mxu2 %v539_v15  ;;  %766 = vmatpush.msrb.mxu3 %v539_v15 }
  0x5f   : > { %728 = vmatmul.msk.f32.gmra.mxu0 %vm302_vm0, %v289_v14 }
  0x60   : > { %563 = vmatpush.msra.mxu2 %v538_v17  ;;  %767 = vmatpush.msrb.mxu3 %v538_v17 }
  0x62   : > { %564 = vmatpush.msra.mxu2 %v537_v18  ;;  %768 = vmatpush.msrb.mxu3 %v537_v18 }
  0x67   : > { %729 = vmatmul.msk.f32.gmra.mxu0 %vm302_vm0, %v290_v19  ;;  %v536_v19 = vld [vmem:[%s1198_s5 + $0x18] sm:$0xff] }
  0x68   : > { %565 = vmatpush.msra.mxu2 %v536_v19  ;;  %769 = vmatpush.msrb.mxu3 %v536_v19 }
  0x6a   : > { %566 = vmatpush.msra.mxu2 %v535_v22  ;;  %770 = vmatpush.msrb.mxu3 %v535_v22 }
  0x6f   : > { %730 = vmatmul.msk.f32.gmra.mxu0 %vm302_vm0, %v291_v24  ;;  %v534_v24 = vld [vmem:[%s1198_s5 + $0x8] sm:$0xff] }
  0x70   : > { %567 = vmatpush.msra.mxu2 %v534_v24  ;;  %771 = vmatpush.msrb.mxu3 %v534_v24 }
  0x72   : > { %568 = vmatpush.msra.mxu2 %v533_v25  ;;  %772 = vmatpush.msrb.mxu3 %v533_v25 }
  0x77   : > { %731 = vmatmul.msk.f32.gmra.mxu0 %vm302_vm0, %v292_v28 }
  0x7f   : > { %732 = vmatmul.msk.f32.gmra.mxu0 %vm302_vm0, %v293_v31 }
  0x87   : > { %733 = vmatmul.msk.f32.gmra.mxu0 %vm302_vm0, %v294_v32 }
  0x8f   : > { %734 = vmatmul.msk.f32.gmra.mxu0 %vm302_vm0, %v295_v33 }
  0x94   : > { %v368_v35 = vpop.f32.mrf.mxu0 }
  0x95   : > { %v369_v36 = vadd.f32 %v1066_v34, %v368_v35 }
  0x97   : > { %v416_v37 = vmax.f32 %v369_v36, 0.0  ;;  %v815_v36 = vld [vmem:[%s1197_s4] ss:$0 sm:$0xff] }
  0x99   : > { %468 = vmatmul.f32.vlgmr.msra.gmra.mxu1 %v416_v37 }
  0x9c   : > { %v371_v38 = vpop.f32.mrf.mxu0 }
  0x9d   : > { %v372_v39 = vadd.f32 %v1066_v34, %v371_v38 }
  0x9f   : > { %v417_v40 = vmax.f32 %v372_v39, 0.0 }
  0xa1   : > { %471 = vmatmul.f32.gmra.mxu1 %v417_v40 }
  0xa4   : > { %v374_v41 = vpop.f32.mrf.mxu0 }
  0xa5   : > { %v375_v42 = vadd.f32 %v1066_v34, %v374_v41 }
  0xa7   : > { %v418_v43 = vmax.f32 %v375_v42, 0.0 }
  0xa9   : > { %474 = vmatmul.f32.gmra.mxu1 %v418_v43 }
  0xac   : > { %v377_v44 = vpop.f32.mrf.mxu0 }
  0xad   : > { %v378_v45 = vadd.f32 %v1066_v34, %v377_v44 }
  0xaf   : > { %v419_v46 = vmax.f32 %v378_v45, 0.0 }
  0xb1   : > { %477 = vmatmul.f32.gmra.mxu1 %v419_v46 }
  0xb4   : > { %v380_v47 = vpop.f32.mrf.mxu0 }
  0xb5   : > { %v381_v48 = vadd.f32 %v1066_v34, %v380_v47 }
  0xb7   : > { %v420_v49 = vmax.f32 %v381_v48, 0.0 }
  0xb9   : > { %480 = vmatmul.f32.gmra.mxu1 %v420_v49 }
  0xbc   : > { %v383_v50 = vpop.f32.mrf.mxu0 }
  0xbd   : > { %v384_v51 = vadd.f32 %v1066_v34, %v383_v50 }
  0xbf   : > { %v421_v52 = vmax.f32 %v384_v51, 0.0 }
  0xc1   : > { %483 = vmatmul.f32.gmra.mxu1 %v421_v52 }
  0xc4   : > { %v386_v53 = vpop.f32.mrf.mxu0 }
  0xc5   : > { %v387_v54 = vadd.f32 %v1066_v34, %v386_v53 }
  0xc7   : > { %v422_v55 = vmax.f32 %v387_v54, 0.0 }
  0xc9   : > { %486 = vmatmul.f32.gmra.mxu1 %v422_v55 }
  0xcc   : > { %v389_v56 = vpop.f32.mrf.mxu0 }
  0xcd   : > { %v390_v57 = vadd.f32 %v1066_v34, %v389_v56 }
  0xcf   : > { %v423_v58 = vmax.f32 %v390_v57, 0.0 }
  0xd1   : > { %489 = vmatmul.f32.gmra.mxu1 %v423_v58 }
  0xd4   : > { %v392_v59 = vpop.f32.mrf.mxu0 }
  0xd5   : > { %v393_v60 = vadd.f32 %v1066_v34, %v392_v59 }
  0xd7   : > { %v424_v61 = vmax.f32 %v393_v60, 0.0 }
  0xd9   : > { %492 = vmatmul.f32.gmra.mxu1 %v424_v61 }
  0xdc   : > { %v395_v63 = vpop.f32.mrf.mxu0 }
  0xdd   : > { %v396_v0 = vadd.f32 %v1066_v34, %v395_v63 }
  0xdf   : > { %v425_v2 = vmax.f32 %v396_v0, 0.0 }
  0xe1   : > { %495 = vmatmul.f32.gmra.mxu1 %v425_v2 }
  0xe4   : > { %v398_v6 = vpop.f32.mrf.mxu0 }
  0xe5   : > { %v399_v7 = vadd.f32 %v1066_v34, %v398_v6 }
  0xe7   : > { %v426_v9 = vmax.f32 %v399_v7, 0.0 }
  0xe9   : > { %498 = vmatmul.f32.gmra.mxu1 %v426_v9 }
  0xec   : > { %v401_v13 = vpop.f32.mrf.mxu0 }
  0xed   : > { %v402_v14 = vadd.f32 %v1066_v34, %v401_v13 }
  0xef   : > { %v427_v16 = vmax.f32 %v402_v14, 0.0 }
  0xf1   : > { %501 = vmatmul.f32.gmra.mxu1 %v427_v16 }
  0xf4   : > { %v404_v20 = vpop.f32.mrf.mxu0 }
  0xf5   : > { %v405_v21 = vadd.f32 %v1066_v34, %v404_v20  ;;  %v816_v20 = vld [vmem:[%s1199_s6] ss:$0 sm:$0xff] }
  0xf7   : > { %v428_v23 = vmax.f32 %v405_v21, 0.0 }
  0xf9   : > { %504 = vmatmul.f32.vlgmr.msra.gmra.mxu3 %v428_v23 }
  0xfc   : > { %v407_v26 = vpop.f32.mrf.mxu0 }
  0xfd   : > { %v408_v27 = vadd.f32 %v1066_v34, %v407_v26 }
  0xff   : > { %v429_v28 = vmax.f32 %v408_v27, 0.0 }
 0x101   : > { %507 = vmatmul.f32.gmra.mxu3 %v429_v28 }
 0x104   : > { %v410_v29 = vpop.f32.mrf.mxu0 }
 0x105   : > { %v411_v30 = vadd.f32 %v1066_v34, %v410_v29 }
 0x107   : > { %v430_v31 = vmax.f32 %v411_v30, 0.0 }
 0x109   : > { %510 = vmatmul.f32.gmra.mxu3 %v430_v31 }
 0x10c   : > { %v413_v32 = vpop.f32.mrf.mxu0 }
 0x10d   : > { %v414_v33 = vadd.f32 %v1066_v34, %v413_v32 }
 0x10f   : > { %v431_v35 = vmax.f32 %v414_v33, 0.0 }
 0x111   : > { %513 = vmatmul.f32.gmra.mxu3 %v431_v35 }
 0x116   : > { %v469_v37 = vpop.f32.mrf.mxu1 }
 0x117   : > { %v470_v38 = vadd.f32 %v815_v36, %v469_v37 }
 0x119   : > { %v517_v39 = vmax.f32 %v470_v38, 0.0 }
 0x11b   : > { %569 = vmatmul.f32.vlgmr.msra.gmra.mxu2 %v517_v39 }
 0x11e   : > { %v472_v40 = vpop.f32.mrf.mxu1 }
 0x11f   : > { %v473_v41 = vadd.f32 %v815_v36, %v472_v40 }
 0x121   : > { %v518_v42 = vmax.f32 %v473_v41, 0.0 }
 0x123   : > { %572 = vmatmul.f32.gmra.mxu2 %v518_v42 }
 0x126   : > { %v475_v43 = vpop.f32.mrf.mxu1 }
 0x127   : > { %v476_v44 = vadd.f32 %v815_v36, %v475_v43 }
 0x129   : > { %v519_v45 = vmax.f32 %v476_v44, 0.0 }
 0x12b   : > { %575 = vmatmul.f32.gmra.mxu2 %v519_v45 }
 0x12e   : > { %v478_v46 = vpop.f32.mrf.mxu1 }
 0x12f   : > { %v479_v34 = vadd.f32 %v815_v36, %v478_v46 }
 0x131   : > { %v520_v47 = vmax.f32 %v479_v34, 0.0 }
 0x133   : > { %578 = vmatmul.f32.gmra.mxu2 %v520_v47 }
 0x136   : > { %v481_v48 = vpop.f32.mrf.mxu1 }
 0x137   : > { %v482_v49 = vadd.f32 %v815_v36, %v481_v48 }
 0x139   : > { %v521_v50 = vmax.f32 %v482_v49, 0.0 }
 0x13b   : > { %581 = vmatmul.f32.gmra.mxu2 %v521_v50 }
 0x13e   : > { %v484_v51 = vpop.f32.mrf.mxu1 }
 0x13f   : > { %v485_v52 = vadd.f32 %v815_v36, %v484_v51 }
 0x141   : > { %v522_v53 = vmax.f32 %v485_v52, 0.0 }
 0x143   : > { %584 = vmatmul.f32.gmra.mxu2 %v522_v53 }
 0x146   : > { %v487_v54 = vpop.f32.mrf.mxu1 }
 0x147   : > { %v488_v55 = vadd.f32 %v815_v36, %v487_v54 }
 0x149   : > { %v523_v56 = vmax.f32 %v488_v55, 0.0 }
 0x14b   : > { %587 = vmatmul.f32.gmra.mxu2 %v523_v56 }
 0x14e   : > { %v490_v57 = vpop.f32.mrf.mxu1 }
 0x14f   : > { %v491_v58 = vadd.f32 %v815_v36, %v490_v57 }
 0x151   : > { %v524_v59 = vmax.f32 %v491_v58, 0.0 }
 0x153   : > { %590 = vmatmul.f32.gmra.mxu2 %v524_v59 }
 0x156   : > { %v493_v60 = vpop.f32.mrf.mxu1 }
 0x157   : > { %v494_v61 = vadd.f32 %v815_v36, %v493_v60 }
 0x159   : > { %v525_v62 = vmax.f32 %v494_v61, 0.0 }
 0x15b   : > { %593 = vmatmul.f32.gmra.mxu2 %v525_v62 }
 0x15e   : > { %v496_v63 = vpop.f32.mrf.mxu1 }
 0x15f   : > { %v497_v0 = vadd.f32 %v815_v36, %v496_v63 }
 0x161   : > { %v526_v1 = vmax.f32 %v497_v0, 0.0 }
 0x163   : > { %596 = vmatmul.f32.gmra.mxu2 %v526_v1 }
 0x166   : > { %v499_v2 = vpop.f32.mrf.mxu1 }
 0x167   : > { %v500_v3 = vadd.f32 %v815_v36, %v499_v2 }
 0x169   : > { %v527_v4 = vmax.f32 %v500_v3, 0.0 }
 0x16b   : > { %599 = vmatmul.f32.gmra.mxu2 %v527_v4 }
 0x16e   : > { %v502_v5 = vpop.f32.mrf.mxu1 }
 0x16f   : > { %v503_v6 = vadd.f32 %v815_v36, %v502_v5 }
 0x171   : > { %v528_v7 = vmax.f32 %v503_v6, 0.0 }
 0x173   : > { %602 = vmatmul.f32.gmra.mxu2 %v528_v7 }
 0x17c   : > { %v505_v8 = vpop.f32.mrf.mxu3 }
 0x17d   : > { %v506_v9 = vadd.f32 %v815_v36, %v505_v8 }
 0x17f   : > { %v529_v10 = vmax.f32 %v506_v9, 0.0 }
 0x181   : > { %605 = vmatmul.f32.vlgmr.msrb.gmra.mxu3 %v529_v10 }
 0x184   : > { %v508_v11 = vpop.f32.mrf.mxu3 }
 0x185   : > { %v509_v12 = vadd.f32 %v815_v36, %v508_v11 }
 0x187   : > { %v530_v13 = vmax.f32 %v509_v12, 0.0 }
 0x189   : > { %608 = vmatmul.f32.gmra.mxu3 %v530_v13 }
 0x18c   : > { %v511_v14 = vpop.f32.mrf.mxu3 }
 0x18d   : > { %v512_v15 = vadd.f32 %v815_v36, %v511_v14 }
 0x18f   : > { %v531_v16 = vmax.f32 %v512_v15, 0.0 }
 0x191   : > { %611 = vmatmul.f32.gmra.mxu3 %v531_v16 }
 0x194   : > { %v514_v17 = vpop.f32.mrf.mxu3 }
 0x195   : > { %v515_v18 = vadd.f32 %v815_v36, %v514_v17 }
 0x197   : > { %v532_v19 = vmax.f32 %v515_v18, 0.0 }
 0x199   : > { %614 = vmatmul.f32.gmra.mxu3 %v532_v19 }
 0x19e   : > { %v570_v21 = vpop.f32.mrf.mxu2 }
 0x19f   : > { %v571_v22 = vadd.f32 %v816_v20, %v570_v21 }
 0x1a1   : > { %618 = vst [vmem:[%s1141_s9] sm:$0xff] %v571_v22 }
 0x1a6   : > { %v573_v23 = vpop.f32.mrf.mxu2 }
 0x1a7   : > { %v574_v24 = vadd.f32 %v816_v20, %v573_v23 }
 0x1a9   : > { %619 = vst [vmem:[%s1141_s9 + $0x8] sm:$0xff] %v574_v24 }
 0x1ae   : > { %v576_v25 = vpop.f32.mrf.mxu2 }
 0x1af   : > { %v577_v26 = vadd.f32 %v816_v20, %v576_v25 }
 0x1b1   : > { %620 = vst [vmem:[%s1141_s9 + $0x10] sm:$0xff] %v577_v26 }
 0x1b6   : > { %v579_v27 = vpop.f32.mrf.mxu2 }
 0x1b7   : > { %v580_v28 = vadd.f32 %v816_v20, %v579_v27 }
 0x1b9   : > { %621 = vst [vmem:[%s1141_s9 + $0x18] sm:$0xff] %v580_v28 }
 0x1be   : > { %v582_v29 = vpop.f32.mrf.mxu2 }
 0x1bf   : > { %v583_v30 = vadd.f32 %v816_v20, %v582_v29 }
 0x1c1   : > { %622 = vst [vmem:[%s1141_s9 + $0x20] sm:$0xff] %v583_v30 }
 0x1c6   : > { %v585_v31 = vpop.f32.mrf.mxu2 }
 0x1c7   : > { %v586_v32 = vadd.f32 %v816_v20, %v585_v31 }
 0x1c9   : > { %623 = vst [vmem:[%s1141_s9 + $0x28] sm:$0xff] %v586_v32 }
 0x1ce   : > { %v588_v33 = vpop.f32.mrf.mxu2 }
 0x1cf   : > { %v589_v35 = vadd.f32 %v816_v20, %v588_v33 }
 0x1d1   : > { %624 = vst [vmem:[%s1141_s9 + $0x30] sm:$0xff] %v589_v35 }
 0x1d6   : > { %v591_v36 = vpop.f32.mrf.mxu2 }
 0x1d7   : > { %v592_v37 = vadd.f32 %v816_v20, %v591_v36 }
 0x1d9   : > { %625 = vst [vmem:[%s1141_s9 + $0x38] sm:$0xff] %v592_v37 }
 0x1de   : > { %v594_v38 = vpop.f32.mrf.mxu2 }
 0x1df   : > { %v595_v39 = vadd.f32 %v816_v20, %v594_v38 }
 0x1e1   : > { %626 = vst [vmem:[%s1141_s9 + $0x40] sm:$0xff] %v595_v39 }
 0x1e6   : > { %v597_v40 = vpop.f32.mrf.mxu2 }
 0x1e7   : > { %v598_v41 = vadd.f32 %v816_v20, %v597_v40 }
 0x1e9   : > { %627 = vst [vmem:[%s1141_s9 + $0x48] sm:$0xff] %v598_v41 }
 0x1ee   : > { %v600_v42 = vpop.f32.mrf.mxu2 }
 0x1ef   : > { %v601_v43 = vadd.f32 %v816_v20, %v600_v42 }
 0x1f1   : > { %628 = vst [vmem:[%s1141_s9 + $0x50] sm:$0xff] %v601_v43 }
 0x1f6   : > { %v603_v44 = vpop.f32.mrf.mxu2 }
 0x1f7   : > { %v604_v45 = vadd.f32 %v816_v20, %v603_v44 }
 0x1f9   : > { %629 = vst [vmem:[%s1141_s9 + $0x58] sm:$0xff] %v604_v45 }
 0x204   : > { %v606_v46 = vpop.f32.mrf.mxu3 }
 0x205   : > { %v607_v34 = vadd.f32 %v816_v20, %v606_v46 }
 0x207   : > { %630 = vst [vmem:[%s1141_s9 + $0x60] sm:$0xff] %v607_v34 }
 0x20c   : > { %v609_v47 = vpop.f32.mrf.mxu3 }
 0x20d   : > { %v610_v48 = vadd.f32 %v816_v20, %v609_v47 }
 0x20f   : > { %631 = vst [vmem:[%s1141_s9 + $0x68] sm:$0xff] %v610_v48 }
 0x214   : > { %v612_v49 = vpop.f32.mrf.mxu3 }
 0x215   : > { %v613_v50 = vadd.f32 %v816_v20, %v612_v49 }
 0x217   : > { %632 = vst [vmem:[%s1141_s9 + $0x70] sm:$0xff] %v613_v50 }
 0x21c   : > { %v615_v51 = vpop.f32.mrf.mxu3 }
 0x21d   : > { %v616_v52 = vadd.f32 %v816_v20, %v615_v51 }
 0x21f   : > { %633 = vst [vmem:[%s1141_s9 + $0x78] sm:$0xff] %v616_v52 }
 0x220   : > { %844 = shalt.err (!%p841_p3)
}
 0x221   : > { %s881_s22 = smov 128   ;;  %s882_s9 = smov 8  }
 0x222   : > { %773 = dma.vmem_to_hbm [thread:$0]  (%p961_p5), %s648_s16, 2048, %s650_s17, %s635_s18, %s881_s22, %s881_s22, %s882_s9  }
 0x223 PF: > { %p779_p4 = scmp.ge.s32.totalorder %s879_s27, 2  ;;  %s664_s14 = sand.u32 1, %s867_s24  }
 0x224   : > { %s665_s15 = scalar_lea.sflag [#allocation3], %s664_s14 }
 0x225   : > { %p776_p7 = pnand %p779_p4, %p965_p6 }
 0x227   : > { %p777_p8 = pneg %p776_p7 }
 0x229   : > { %862 = dma.done.wait (%p777_p8), %s665_s15, 2048  }
 0x22a   : > { %864 = vsyncadd (%p777_p8), %s665_s15, 4294965248  ;;  %p17_p9 = scmp.ge.s32.totalorder %s948_s30, 4   ;;  %s1203_s24 = smov %s871_s25 }
 0x22b   : > { %s1204_s25 = smov %s875_s26  ;;  %s1205_s26 = smov %s959_s10 }
 0x22c   : > { %s1206_s27 = smov %s948_s30  ;;  %19 = sbr.rel (!%p17_p9) target bundleno = 3 (0x3), region = 83 }
 0x231   :  { %671 = vsyncpa [#allocation3], 1 }
 0x232   :  { %673 = vsyncpa [#allocation3 + $0x1], 1 }

</bundles_post_ra>
